<compile_context>
chip_gen: v5e
topology: v5e:2x2
jax: 0.10.0
libtpu: 0.0.40
codegen_flags: <defaults>
</compile_context>

<pallas_src>
import functools

import jax
import jax.numpy as jnp
from jax.experimental import pallas as pl
from jax.experimental.pallas import tpu as pltpu

EPS = 1e-5  # nn.BatchNorm2d default eps


# --------------------------------------------------------------------------- #
# Hardware-aware budgets
# --------------------------------------------------------------------------- #
def _vmem_capacity_bytes():
    """Physical VMEM per core (64 MiB on v7x, 128 MiB on v5e/v6e)."""
    try:
        info = pltpu.get_tpu_info()
        cap = getattr(info, "vmem_capacity_bytes", None)
        if cap:
            return int(cap)
    except Exception:
        pass
    return 64 * 1024 * 1024  # v7x-safe fallback


def _pick_spatial_tile(hw, c, target_block_bytes=2 << 20):
    """Largest lane-dense (multiple-of-128) spatial tile targeting ~2 MiB/block."""
    if hw <= 128:
        return hw  # tiny spatial extent: whole axis as one (full-extent) block
    cap = max(2048, ((target_block_bytes // (4 * c)) // 128) * 128)
    t = min(cap, (hw // 128) * 128)
    return max(t, 128)


# --------------------------------------------------------------------------- #
# Fused fast path: whole activation resident in VMEM, single kernel
# --------------------------------------------------------------------------- #
def _fused_bn_kernel(x_ref, g_ref, b_ref, o_ref, *, eps, relu):
    x = x_ref[...].astype(jnp.float32)                       # (N, C, HW)
    cnt = jnp.float32(x.shape[0] * x.shape[2])
    # centered variance (avoids E[x^2]-E[x]^2 cancellation; data is resident)
    mean = jnp.sum(jnp.sum(x, axis=2, keepdims=True), axis=0, keepdims=True) / cnt
    xc = x - mean
    var = jnp.sum(jnp.sum(xc * xc, axis=2, keepdims=True), axis=0, keepdims=True) / cnt
    scale = g_ref[...] * jax.lax.rsqrt(var + eps)            # (1, C, 1)
    y = xc * scale + b_ref[...]
    if relu:
        y = jnp.maximum(y, 0.0)
    o_ref[...] = y.astype(o_ref.dtype)


# --------------------------------------------------------------------------- #
# General two-pass path
# --------------------------------------------------------------------------- #
def _stats_kernel(x_ref, sum_ref, sq_ref, *, hw, t):
    """Per-(batch, spatial-tile) partial channel sum / sum-of-squares."""
    x = x_ref[...].astype(jnp.float32)                       # (1, C, T)
    if hw % t != 0:                                          # mask ragged tail
        j = pl.program_id(1)
        lane = jax.lax.broadcasted_iota(jnp.int32, x.shape, 2)
        x = jnp.where(lane < hw - j * t, x, 0.0)
    sum_ref[...] = jnp.sum(x, axis=2, keepdims=True)         # (1, C, 1)
    sq_ref[...] = jnp.sum(x * x, axis=2, keepdims=True)


def _normalize_kernel(x_ref, scale_ref, shift_ref, o_ref, *, relu):
    """y = relu(x * scale + shift); per-channel (sublane) scale/shift."""
    x = x_ref[...].astype(jnp.float32)                       # (1, C, T)
    y = x * scale_ref[...] + shift_ref[...]                  # (1, C, 1) broadcast
    if relu:
        y = jnp.maximum(y, 0.0)
    o_ref[...] = y.astype(o_ref.dtype)                       # lane-dense store


def _partial_map(n_t):
    return lambda i, j: (i * n_t + j, 0, 0)


# --------------------------------------------------------------------------- #
# Public wrapper
# --------------------------------------------------------------------------- #
def batch_norm2d_relu(x_nchw, gamma, beta, *, eps=EPS, fuse_relu=True,
                      force_two_pass=False):
    """Training-mode BatchNorm2d forward (+ optional fused ReLU).

    x: (N, C, H, W); gamma/beta: (C,).  Returns (N, C, H, W) in x's dtype.
    """
    n, c, h, w = x_nchw.shape
    hw = h * w
    x3 = x_nchw.reshape(n, c, hw)                 # pure reshape (no transpose)
    g = gamma.astype(jnp.float32).reshape(1, c, 1)
    b = beta.astype(jnp.float32).reshape(1, c, 1)

    vmem_cap = _vmem_capacity_bytes()
    vmem_limit = int(min((vmem_cap * 3) // 4, 96 * 1024 * 1024))

    # Conservative resident estimate: double-buffered in/out + f32 temps.
    itemsize = jnp.dtype(x_nchw.dtype).itemsize
    resident_est = n * c * hw * (2 * itemsize + 2 * itemsize + 16)
    use_fused = (not force_two_pass) and (resident_est <= vmem_cap // 3)

    if use_fused:
        # ---- single-kernel path: 1 read + 1 write, no extra dispatch --------
        y3 = pl.pallas_call(
            functools.partial(_fused_bn_kernel, eps=eps, relu=fuse_relu),
            out_shape=jax.ShapeDtypeStruct((n, c, hw), x_nchw.dtype),
            grid_spec=pltpu.PrefetchScalarGridSpec(
                num_scalar_prefetch=0,
                grid=(1,),
                in_specs=[
                    pl.BlockSpec((n, c, hw), lambda i: (0, 0, 0)),
                    pl.BlockSpec((1, c, 1), lambda i: (0, 0, 0)),
                    pl.BlockSpec((1, c, 1), lambda i: (0, 0, 0)),
                ],
                out_specs=pl.BlockSpec((n, c, hw), lambda i: (0, 0, 0)),
            ),
            compiler_params=pltpu.CompilerParams(
                dimension_semantics=("arbitrary",),
                vmem_limit_bytes=vmem_limit,
            ),
        )(x3, g, b)
        return y3.reshape(n, c, h, w)

    # ---- general path: two streaming, pipelined passes ----------------------
    t = _pick_spatial_tile(hw, c)
    n_t = -(-hw // t)  # cdiv

    # pass 1: per-(batch, tile) partials; both axes parallel (v7x: both TCs)
    sums, sqs = pl.pallas_call(
        functools.partial(_stats_kernel, hw=hw, t=t),
        out_shape=(
            jax.ShapeDtypeStruct((n * n_t, c, 1), jnp.float32),
            jax.ShapeDtypeStruct((n * n_t, c, 1), jnp.float32),
        ),
        grid_spec=pltpu.PrefetchScalarGridSpec(
            num_scalar_prefetch=0,
            grid=(n, n_t),
            in_specs=[pl.BlockSpec((1, c, t), lambda i, j: (i, 0, j))],
            out_specs=[
                pl.BlockSpec((1, c, 1), _partial_map(n_t)),
                pl.BlockSpec((1, c, 1), _partial_map(n_t)),
            ],
        ),
        compiler_params=pltpu.CompilerParams(
            dimension_semantics=("parallel", "parallel"),
            vmem_limit_bytes=vmem_limit,
        ),
    )(x3)

    # tiny O(n*n_t*C) finalize -> fused per-channel scale/shift (negligible on
    # this path; the dispatch-bound small case takes the fused kernel above)
    m = jnp.float32(n * hw)
    mean = (jnp.sum(sums, axis=0) / m).reshape(1, c, 1)
    ex2 = (jnp.sum(sqs, axis=0) / m).reshape(1, c, 1)
    var = jnp.maximum(ex2 - mean * mean, 0.0)                # biased (training BN)
    inv_std = jax.lax.rsqrt(var + eps)
    scale = g * inv_std
    shift = b - mean * scale

    # pass 2: streaming normalize (+ fused ReLU), fully parallel, lane-dense
    y3 = pl.pallas_call(
        functools.partial(_normalize_kernel, relu=fuse_relu),
        out_shape=jax.ShapeDtypeStruct((n, c, hw), x_nchw.dtype),
        grid_spec=pltpu.PrefetchScalarGridSpec(
            num_scalar_prefetch=0,
            grid=(n, n_t),
            in_specs=[
                pl.BlockSpec((1, c, t), lambda i, j: (i, 0, j)),
                pl.BlockSpec((1, c, 1), lambda i, j: (0, 0, 0)),
                pl.BlockSpec((1, c, 1), lambda i, j: (0, 0, 0)),
            ],
            out_specs=pl.BlockSpec((1, c, t), lambda i, j: (i, 0, j)),
        ),
        compiler_params=pltpu.CompilerParams(
            dimension_semantics=("parallel", "parallel"),
            vmem_limit_bytes=vmem_limit,
        ),
    )(x3, scale, shift)

    return y3.reshape(n, c, h, w)


# TODO(synk): conv1/conv2, max_pool2d, global mean, fc and log_softmax of
# ValueChoiceConvNet (and the NAS ValueChoice/LayerChoice selection) are outside
# the scope of this kernel; only BatchNorm2d (+ the following ReLU) is here.


# --------------------------------------------------------------------------- #
# Self-test
# --------------------------------------------------------------------------- #
def _ref_bn(x, gamma, beta, relu):
    mean = jnp.mean(x, axis=(0, 2, 3), keepdims=True)
    var = jnp.mean((x - mean) ** 2, axis=(0, 2, 3), keepdims=True)
    c = x.shape[1]
    y = (x - mean) * jax.lax.rsqrt(var + EPS) * gamma.reshape(1, c, 1, 1) \
        + beta.reshape(1, c, 1, 1)
    return jnp.maximum(y, 0.0) if relu else y


if __name__ == "__main__":
    key = jax.random.PRNGKey(0)
    k1, k2 = jax.random.split(key)

    # conv1 output with ch1 = ValueChoice([16, 32]) -> 16 channels, 16x16 map.
    N, C, H, W = 2, 16, 16, 16
    x = jax.random.normal(k1, (N, C, H, W), dtype=jnp.float32)
    gamma = 1.0 + 0.1 * jnp.arange(C, dtype=jnp.float32)
    beta = 0.05 * jnp.arange(C, dtype=jnp.float32)

    # 1) fused fast path, BN + ReLU (matches the module's forward)
    y = batch_norm2d_relu(x, gamma, beta, fuse_relu=True)
    jax.block_until_ready(y)
    err = jnp.max(jnp.abs(y - _ref_bn(x, gamma, beta, relu=True)))
    assert err < 1e-4, f"fused BN+ReLU max abs error {err}"

    # 2) fused fast path, BN only (affine semantics without the ReLU fusion)
    y = batch_norm2d_relu(x, gamma, beta, fuse_relu=False)
    jax.block_until_ready(y)
    err = jnp.max(jnp.abs(y - _ref_bn(x, gamma, beta, relu=False)))
    assert err < 1e-4, f"fused BN max abs error {err}"

    # 3) forced two-pass path with a ragged (non-multiple-of-128) spatial extent
    #    to exercise the masked cdiv tiling and partial-sum stats pass.
    N2, C2, H2, W2 = 3, 32, 9, 20
    x2 = jax.random.normal(k2, (N2, C2, H2, W2), dtype=jnp.float32)
    g2 = 1.0 + 0.05 * jnp.arange(C2, dtype=jnp.float32)
    b2 = 0.02 * jnp.arange(C2, dtype=jnp.float32)
    y2 = batch_norm2d_relu(x2, g2, b2, fuse_relu=True, force_two_pass=True)
    jax.block_until_ready(y2)
    err2 = jnp.max(jnp.abs(y2 - _ref_bn(x2, g2, b2, relu=True)))
    assert err2 < 1e-4, f"two-pass BN+ReLU max abs error {err2}"

    print("KERNEL_OK")
</pallas_src>

<mosaic_0001>
module attributes {stable_mosaic.version = 11 : i64} {
  func.func @_fused_bn_kernel(%arg0: i32, %arg1: memref<2x16x256xf32, #tpu.memory_space<vmem>>, %arg2: memref<1x16x1xf32, #tpu.memory_space<vmem>>, %arg3: memref<1x16x1xf32, #tpu.memory_space<vmem>>, %arg4: memref<2x16x256xf32, #tpu.memory_space<vmem>>) attributes {dimension_semantics = [#tpu.dimension_semantics<arbitrary>], iteration_bounds = array<i64: 1>, scalar_prefetch = 0 : i64, scratch_operands = 0 : i64, tpu.core_type = #tpu.core_type<tc>, window_params = [{pipeline_mode = #tpu.pipeline_mode<synchronous>, transform_indices = @transform_0, window_bounds = array<i64: 2, 16, 256>}, {pipeline_mode = #tpu.pipeline_mode<synchronous>, transform_indices = @transform_1, window_bounds = array<i64: 1, 16, 1>}, {pipeline_mode = #tpu.pipeline_mode<synchronous>, transform_indices = @transform_2, window_bounds = array<i64: 1, 16, 1>}, {pipeline_mode = #tpu.pipeline_mode<synchronous>, transform_indices = @transform_3, window_bounds = array<i64: 2, 16, 256>}]} {
    %c0 = arith.constant 0 : index
    %c0_0 = arith.constant 0 : index
    %c0_1 = arith.constant 0 : index
    %0 = vector.load %arg1[%c0, %c0_0, %c0_1] : memref<2x16x256xf32, #tpu.memory_space<vmem>>, vector<2x16x256xf32>
    %cst = arith.constant dense<0.000000e+00> : vector<2x16xf32>
    %1 = vector.multi_reduction <add>, %0, %cst [2] : vector<2x16x256xf32> to vector<2x16xf32>
    %2 = vector.shape_cast %1 : vector<2x16xf32> to vector<2x16x1xf32>
    %cst_2 = arith.constant dense<0.000000e+00> : vector<16x1xf32>
    %3 = vector.multi_reduction <add>, %2, %cst_2 [0] : vector<2x16x1xf32> to vector<16x1xf32>
    %4 = vector.shape_cast %3 : vector<16x1xf32> to vector<1x16x1xf32>
    %cst_3 = arith.constant 5.120000e+02 : f32
    %5 = vector.broadcast %cst_3 : f32 to vector<1x16x1xf32>
    %6 = arith.divf %4, %5 : vector<1x16x1xf32>
    %7 = vector.broadcast %6 : vector<1x16x1xf32> to vector<2x16x256xf32>
    %8 = arith.subf %0, %7 : vector<2x16x256xf32>
    %9 = arith.mulf %8, %8 : vector<2x16x256xf32>
    %cst_4 = arith.constant dense<0.000000e+00> : vector<2x16xf32>
    %10 = vector.multi_reduction <add>, %9, %cst_4 [2] : vector<2x16x256xf32> to vector<2x16xf32>
    %11 = vector.shape_cast %10 : vector<2x16xf32> to vector<2x16x1xf32>
    %cst_5 = arith.constant dense<0.000000e+00> : vector<16x1xf32>
    %12 = vector.multi_reduction <add>, %11, %cst_5 [0] : vector<2x16x1xf32> to vector<16x1xf32>
    %13 = vector.shape_cast %12 : vector<16x1xf32> to vector<1x16x1xf32>
    %cst_6 = arith.constant 5.120000e+02 : f32
    %14 = vector.broadcast %cst_6 : f32 to vector<1x16x1xf32>
    %15 = arith.divf %13, %14 : vector<1x16x1xf32>
    %c0_7 = arith.constant 0 : index
    %c0_8 = arith.constant 0 : index
    %c0_9 = arith.constant 0 : index
    %16 = vector.load %arg2[%c0_7, %c0_8, %c0_9] : memref<1x16x1xf32, #tpu.memory_space<vmem>>, vector<1x16x1xf32>
    %cst_10 = arith.constant 9.99999974E-6 : f32
    %17 = vector.broadcast %cst_10 : f32 to vector<1x16x1xf32>
    %18 = arith.addf %15, %17 : vector<1x16x1xf32>
    %19 = math.rsqrt %18 : vector<1x16x1xf32>
    %20 = arith.mulf %16, %19 : vector<1x16x1xf32>
    %21 = vector.broadcast %20 : vector<1x16x1xf32> to vector<2x16x256xf32>
    %22 = arith.mulf %8, %21 : vector<2x16x256xf32>
    %c0_11 = arith.constant 0 : index
    %c0_12 = arith.constant 0 : index
    %c0_13 = arith.constant 0 : index
    %23 = vector.load %arg3[%c0_11, %c0_12, %c0_13] : memref<1x16x1xf32, #tpu.memory_space<vmem>>, vector<1x16x1xf32>
    %24 = vector.broadcast %23 : vector<1x16x1xf32> to vector<2x16x256xf32>
    %25 = arith.addf %22, %24 : vector<2x16x256xf32>
    %cst_14 = arith.constant 0.000000e+00 : f32
    %26 = vector.broadcast %cst_14 : f32 to vector<2x16x256xf32>
    %27 = arith.maximumf %25, %26 : vector<2x16x256xf32>
    %c0_15 = arith.constant 0 : index
    %c0_16 = arith.constant 0 : index
    %c0_17 = arith.constant 0 : index
    %28 = vector.load %arg4[%c0_15, %c0_16, %c0_17] : memref<2x16x256xf32, #tpu.memory_space<vmem>>, vector<2x16x256xf32>
    tpu.vector_store %arg4[%c0_15, %c0_16, %c0_17], %27 {strides = array<i32>} : memref<2x16x256xf32, #tpu.memory_space<vmem>>, vector<2x16x256xf32>,
    return
  }
  func.func @transform_0(%arg0: i32) -> (i32, i32, i32) {
    %c0_i32 = arith.constant 0 : i32
    %c0_i32_0 = arith.constant 0 : i32
    %c0_i32_1 = arith.constant 0 : i32
    %c0_i32_2 = arith.constant 0 : i32
    return %c0_i32, %c0_i32_0, %c0_i32_1 : i32, i32, i32
  }
  func.func @transform_1(%arg0: i32) -> (i32, i32, i32) {
    %c0_i32 = arith.constant 0 : i32
    %c0_i32_0 = arith.constant 0 : i32
    %c0_i32_1 = arith.constant 0 : i32
    %c0_i32_2 = arith.constant 0 : i32
    return %c0_i32, %c0_i32_0, %c0_i32_1 : i32, i32, i32
  }
  func.func @transform_2(%arg0: i32) -> (i32, i32, i32) {
    %c0_i32 = arith.constant 0 : i32
    %c0_i32_0 = arith.constant 0 : i32
    %c0_i32_1 = arith.constant 0 : i32
    %c0_i32_2 = arith.constant 0 : i32
    return %c0_i32, %c0_i32_0, %c0_i32_1 : i32, i32, i32
  }
  func.func @transform_3(%arg0: i32) -> (i32, i32, i32) {
    %c0_i32 = arith.constant 0 : i32
    %c0_i32_0 = arith.constant 0 : i32
    %c0_i32_1 = arith.constant 0 : i32
    %c0_i32_2 = arith.constant 0 : i32
    return %c0_i32, %c0_i32_0, %c0_i32_1 : i32, i32, i32
  }
}

</mosaic_0001>

<bundles_post_ra>
// kernel: tpu_custom_call.1
= control target key start
LH: loop header
LB: loop body
LE: loop exit
PB: predicated region body
PF: predicated region fallthrough
CT: control target
= control target key end

     0   :  { %8 = vsyncpa [#allocation3], 0  ;;  %s350_s0 = inlined_call_operand.hbm [shape: f32[2,16,256], index: 0, kind: input, shape index: {}]   ;;  %s351_s1 = inlined_call_operand.vmem [shape: f32[1,16,1], index: 1, kind: input, shape index: {}]   ;;  %s352_s2 = inlined_call_operand.vmem [shape: f32[1,16,1], index: 2, kind: input, shape index: {}]   ;;  %s353_s3 = inlined_call_operand.hbm [shape: f32[2,16,256], index: 3, kind: output, shape index: {}]  }
   0x1   :  { %9 = vsyncpa [#allocation4], 0  ;;  %s14_s14 = sshll.u32 %s350_s0, 4  ;;  %s260_s15 = smov [#allocation2]   ;;  %s15_s14 = int_to_ptr.hbm [resolvable:$true] %s14_s14 }
   0x2   :  { %s16_s16 = sshll.u32 %s260_s15, 4  ;;  %s261_s17 = smov 256   ;;  %s17_s16 = int_to_ptr.vmem [resolvable:$true] %s16_s16 }
   0x3   :  { %s262_s18 = smov 16  }
   0x4   :  { %22 = dma.hbm_to_vmem [thread:$0]  %s15_s14, 1024, %s17_s16, [#allocation3], %s261_s17, %s261_s17, %s262_s18  }
   0x5   :  { %256 = dma.done.wait [#allocation3], 1024  }
   0x6   :  { %257 = vsyncadd [#allocation3], 4294966272  ;;  %v35_v0 = vld [vmem:[#allocation2 + $0x20] sm:$0xff]  ;;  %v36_v1 = vld [vmem:[#allocation2 + $0x28] sm:$0xff]  ;;  %v263_v12 = vmov 512.0   ;;  %v264_v47 = vmov 0  }
   0x7   :  { %v31_v2 = vld [vmem:[#allocation2] sm:$0xff]  ;;  %v45_v3 = vadd.f32 %v36_v1, %v35_v0  ;;  %v32_v4 = vld [vmem:[#allocation2 + $0x8] sm:$0xff]  ;;  %v37_v6 = vld [vmem:[#allocation2 + $0x30] sm:$0xff]  ;;  %202 = vrcp.f32 %v263_v12  ;;  %201 = vset.pattern.permute.xlu1 %v264_v47  ;;  %199 = vset.pattern.permute.xlu2 %v264_v47  ;;  %s180_s28 = sshll.u32 %s353_s3, 4  ;;  %s181_s28 = int_to_ptr.hbm [resolvable:$true] %s180_s28 }
   0x8   :  { %v39_v5 = vadd.f32 %v32_v4, %v31_v2  ;;  %v38_v7 = vld [vmem:[#allocation2 + $0x38] sm:$0xff]  ;;  %v33_v8 = vld [vmem:[#allocation2 + $0x10] sm:$0xff]  ;;  %v138_v48 = vld [vmem:[%s352_s2] sm:$0xff]  ;;  %200 = vset.pattern.permute.xlu0 %v264_v47 }
   0x9   :  { %46 = vadd.xlane.f32.xlu1 %v45_v3  ;;  %v34_v9 = vld [vmem:[#allocation2 + $0x18] sm:$0xff]  ;;  %v48_v10 = vadd.f32 %v38_v7, %v37_v6  ;;  %v139_v12 = vld [vmem:[%s352_s2 + $0x8] sm:$0xff] }
   0xa   :  { %40 = vadd.xlane.f32.xlu0 %v39_v5  ;;  %v42_v11 = vadd.f32 %v34_v9, %v33_v8 }
   0xd   :  { %v203_v13 = vpop.eup %202 }
   0xe   :  { %v54_v14 = vmul.f32 512.0, %v203_v13  ;;  %vm58_vm0 = vweird.f32 %v203_v13 }
  0x10   :  { %v55_v15 = vsub.f32 1.0, %v54_v14 }
  0x11   :  { %49 = vadd.xlane.f32.xlu1 %v48_v10 }
  0x12   :  { %43 = vadd.xlane.f32.xlu0 %v42_v11  ;;  %v56_v16 = vmul.f32 %v203_v13, %v55_v15 }
  0x14   :  { %v57_v17 = vadd.f32 %v203_v13, %v56_v16 }
  0x16   :  { %v59_v19 = vsel %vm58_vm0, %v203_v13, %v57_v17 }
  0x7c   :  { %v47_v18 = vpop.xlane.xlu1 %46 }
  0x7d   :  { %v41_v20 = vpop.xlane.xlu0 %40 }
  0x7e   :  { %v51_v21 = vadd.f32 %v47_v18, %v41_v20 }
  0x80   :  { %v60_v22 = vmul.f32 %v59_v19, %v51_v21 }
  0x82   :  { %v292_v23 = vsub.f32 %v35_v0, %v60_v22  ;;  %v294_v24 = vsub.f32 %v36_v1, %v60_v22  ;;  %v296_v25 = vsub.f32 %v31_v2, %v60_v22  ;;  %v298_v26 = vsub.f32 %v32_v4, %v60_v22  ;;  %v94_v2 = vld [vmem:[%s351_s1] sm:$0xff] }
  0x84   :  { %v50_v27 = vpop.xlane.xlu1 %49  ;;  %v74_v28 = vmul.f32 %v292_v23, %v292_v23  ;;  %v75_v29 = vmul.f32 %v294_v24, %v294_v24  ;;  %v70_v30 = vmul.f32 %v296_v25, %v296_v25  ;;  %v71_v31 = vmul.f32 %v298_v26, %v298_v26 }
  0x85   :  { %v44_v32 = vpop.xlane.xlu0 %43 }
  0x86   :  { %v52_v33 = vadd.f32 %v50_v27, %v44_v32  ;;  %v84_v34 = vadd.f32 %v75_v29, %v74_v28  ;;  %v78_v35 = vadd.f32 %v71_v31, %v70_v30 }
  0x88   :  { %v61_v36 = vmul.f32 %v59_v19, %v52_v33  ;;  %85 = vadd.xlane.f32.xlu0 %v84_v34  ;;  %79 = vadd.xlane.f32.xlu2 %v78_v35 }
  0x8a   :  { %v308_v37 = vsub.f32 %v37_v6, %v61_v36  ;;  %v310_v38 = vsub.f32 %v38_v7, %v61_v36  ;;  %v312_v39 = vsub.f32 %v33_v8, %v61_v36  ;;  %v314_v40 = vsub.f32 %v34_v9, %v61_v36  ;;  %v95_v9 = vld [vmem:[%s351_s1 + $0x8] sm:$0xff]  ;;  %s265_s1 = smov [#allocation5]  }
  0x8b   :  { %s178_s2 = sshll.u32 %s265_s1, 4  ;;  %s179_s2 = int_to_ptr.vmem [resolvable:$true] %s178_s2 }
  0x8c   :  { %v76_v41 = vmul.f32 %v308_v37, %v308_v37  ;;  %v77_v42 = vmul.f32 %v310_v38, %v310_v38  ;;  %v72_v43 = vmul.f32 %v312_v39, %v312_v39  ;;  %v73_v44 = vmul.f32 %v314_v40, %v314_v40 }
  0x8e   :  { %v87_v45 = vadd.f32 %v77_v42, %v76_v41  ;;  %v81_v46 = vadd.f32 %v73_v44, %v72_v43 }
  0x90   :  { %88 = vadd.xlane.f32.xlu1 %v87_v45  ;;  %82 = vadd.xlane.f32.xlu2 %v81_v46 }
  0xa9   :  { %142 = vperm.xlu1 %201, %v138_v48  }
  0xfb   :  { %v80_v49 = vpop.xlane.xlu2 %79  ;;  %v86_v50 = vpop.xlane.xlu0 %85 }
  0xfc   :  { %v90_v51 = vadd.f32 %v86_v50, %v80_v49 }
  0xfe   :  { %v92_v52 = vmul.f32 %v90_v51, %v59_v19 }
 0x100   :  { %v96_v53 = vadd.f32 1e-05, %v92_v52 }
 0x102   :  { %204 = vrsqrt.f32 %v96_v53  ;;  %vm104_vm2 = vweird.f32 %v96_v53 }
 0x103   :  { %v89_v54 = vpop.xlane.xlu1 %88  ;;  %v83_v55 = vpop.xlane.xlu2 %82 }
 0x104   :  { %v91_v56 = vadd.f32 %v89_v54, %v83_v55 }
 0x106   :  { %v93_v57 = vmul.f32 %v91_v56, %v59_v19 }
 0x108   :  { %v205_v58 = vpop.eup %204  ;;  %v97_v59 = vadd.f32 1e-05, %v93_v57 }
 0x109   :  { %v99_v60 = vmul.f32 %v205_v58, %v96_v53  ;;  %vm105_vm1 = vweird.f32 %v205_v58 }
 0x10a   :  { %206 = vrsqrt.f32 %v97_v59  ;;  %vm106_vm3 = vmor %vm104_vm2, %vm105_vm1  ;;  %vm114_vm5 = vweird.f32 %v97_v59 }
 0x10b   :  { %v100_v61 = vmul.f32 %v205_v58, %v99_v60 }
 0x10d   :  { %v101_v62 = vmul.f32 0.5, %v100_v61 }
 0x10f   :  { %v102_v63 = vsub.f32 1.5, %v101_v62 }
 0x110   :  { %v207_v0 = vpop.eup %206 }
 0x111   :  { %v109_v1 = vmul.f32 %v207_v0, %v97_v59  ;;  %v103_v3 = vmul.f32 %v205_v58, %v102_v63  ;;  %vm115_vm4 = vweird.f32 %v207_v0 }
 0x112   :  { %vm116_vm6 = vmor %vm114_vm5, %vm115_vm4 }
 0x113   :  { %v110_v4 = vmul.f32 %v207_v0, %v109_v1  ;;  %v107_v5 = vsel %vm106_vm3, %v205_v58, %v103_v3 }
 0x114   :  { %v118_v6 = vmul.f32 %v107_v5, %v94_v2 }
 0x115   :  { %v111_v7 = vmul.f32 0.5, %v110_v4 }
 0x116   :  { %122 = vperm.xlu2 %199, %v118_v6  }
 0x117   :  { %v112_v8 = vsub.f32 1.5, %v111_v7 }
 0x119   :  { %v113_v10 = vmul.f32 %v207_v0, %v112_v8 }
 0x11b   :  { %v117_v11 = vsel %vm116_vm6, %v207_v0, %v113_v10  ;;  %v143_v15 = vpop.permute.xlu1 %142 }
 0x11c   :  { %v119_v13 = vmul.f32 %v117_v11, %v95_v9 }
 0x11e   :  { %127 = vperm.xlu0 %200, %v119_v13   ;;  %147 = vperm.xlu2 %199, %v139_v12  }
 0x170   :  { %v123_v14 = vpop.permute.xlu2 %122 }
 0x171   :  { %v130_v16 = vmul.f32 %v123_v14, %v296_v25  ;;  %v131_v17 = vmul.f32 %v123_v14, %v298_v26  ;;  %v134_v18 = vmul.f32 %v123_v14, %v292_v23  ;;  %v135_v19 = vmul.f32 %v123_v14, %v294_v24 }
 0x173   :  { %v150_v20 = vadd.f32 %v143_v15, %v130_v16  ;;  %v151_v21 = vadd.f32 %v143_v15, %v131_v17  ;;  %v154_v22 = vadd.f32 %v143_v15, %v134_v18  ;;  %v155_v27 = vadd.f32 %v143_v15, %v135_v19 }
 0x175   :  { %v158_v28 = vmax.f32 %v150_v20, 0.0  ;;  %v159_v29 = vmax.f32 %v151_v21, 0.0  ;;  %v162_v30 = vmax.f32 %v154_v22, 0.0  ;;  %v163_v31 = vmax.f32 %v155_v27, 0.0 }
 0x177   :  { %166 = vst [vmem:[#allocation5] sm:$0xff] %v158_v28 }
 0x178   :  { %167 = vst [vmem:[#allocation5 + $0x8] sm:$0xff] %v159_v29  ;;  %v148_v33 = vpop.permute.xlu2 %147 }
 0x179   :  { %170 = vst [vmem:[#allocation5 + $0x20] sm:$0xff] %v162_v30 }
 0x17a   :  { %171 = vst [vmem:[#allocation5 + $0x28] sm:$0xff] %v163_v31 }
 0x190   :  { %v128_v32 = vpop.permute.xlu0 %127 }
 0x191   :  { %v132_v25 = vmul.f32 %v128_v32, %v312_v39  ;;  %v133_v26 = vmul.f32 %v128_v32, %v314_v40  ;;  %v136_v23 = vmul.f32 %v128_v32, %v308_v37  ;;  %v137_v24 = vmul.f32 %v128_v32, %v310_v38 }
 0x193   :  { %v152_v34 = vadd.f32 %v148_v33, %v132_v25  ;;  %v153_v35 = vadd.f32 %v148_v33, %v133_v26  ;;  %v156_v36 = vadd.f32 %v148_v33, %v136_v23  ;;  %v157_v41 = vadd.f32 %v148_v33, %v137_v24 }
 0x195   :  { %v160_v42 = vmax.f32 %v152_v34, 0.0  ;;  %v161_v43 = vmax.f32 %v153_v35, 0.0  ;;  %v164_v44 = vmax.f32 %v156_v36, 0.0  ;;  %v165_v39 = vmax.f32 %v157_v41, 0.0 }
 0x197   :  { %168 = vst [vmem:[#allocation5 + $0x10] sm:$0xff] %v160_v42 }
 0x198   :  { %169 = vst [vmem:[#allocation5 + $0x18] sm:$0xff] %v161_v43 }
 0x199   :  { %172 = vst [vmem:[#allocation5 + $0x30] sm:$0xff] %v164_v44 }
 0x19a   :  { %173 = vst [vmem:[#allocation5 + $0x38] sm:$0xff] %v165_v39 }
 0x19b   :  { %186 = dma.vmem_to_hbm [thread:$0]  %s179_s2, 1024, %s181_s28, [#allocation4], %s261_s17, %s261_s17, %s262_s18  }
 0x19c   :  { %258 = dma.done.wait [#allocation4], 1024  }
 0x19d   :  { %259 = vsyncadd [#allocation4], 4294966272 }
 0x19e   :  { %191 = vsyncpa [#allocation3], 1 }
 0x19f   :  { %192 = vsyncpa [#allocation4], 1 }

</bundles_post_ra>
